<compile_context>
chip_gen: v6e
topology: v6e:2x2x1
jax: 0.10.0
libtpu: 0.0.40
codegen_flags: <defaults>
</compile_context>

<pallas_src>
import functools

import jax
import jax.numpy as jnp
from jax.experimental import pallas as pl
from jax.experimental.pallas import tpu as pltpu

MARGIN = 2.0
_PD_EPS = 1e-6                 # F.pairwise_distance default eps (added to the difference)
_LANE = 128
_VMEM_TILE_BUDGET = 16 * 1024 * 1024   # per-step double-buffered tile budget (all gens)
_VMEM_LIMIT = 48 * 1024 * 1024         # < 64 MiB physical on v7x; fine on v5e/v6e
_MAX_TILE_ROWS = 1024                  # f32 streaming ~86% of HBM roofline at 1024 rows


def _round_up(x, m):
    return ((x + m - 1) // m) * m


def _contrastive_loss_kernel(o1_ref, o2_ref, lbl_ref, partial_ref, *,
                             batch, tile_rows, margin, feat_dim):
    """One batch tile -> one (1, 1) raw partial sum (distinct output block per step).

    o1_ref, o2_ref: (TB, Dp); lbl_ref: (TB, 1); partial_ref: (1, 1) f32.
    feat_dim is the true (unpadded) feature dim; lanes >= feat_dim are host
    zero-padding and must not receive the eps term.
    """
    i = pl.program_id(0)

    o1 = o1_ref[...].astype(jnp.float32)
    o2 = o2_ref[...].astype(jnp.float32)
    lbl = lbl_ref[...].astype(jnp.float32)                      # (TB, 1)

    diff = o1 - o2 + _PD_EPS                                    # torch pairwise_distance eps
    if feat_dim != o1.shape[-1]:
        # Feature dim was padded to a lane multiple: keep eps off the pad lanes.
        lane = jax.lax.broadcasted_iota(jnp.int32, diff.shape, 1)
        diff = jnp.where(lane < feat_dim, diff, 0.0)

    sq_sum = jnp.sum(diff * diff, axis=-1, keepdims=True)       # (TB, 1)
    dist = jnp.sqrt(sq_sum)                                     # euclidean_distance
    dist_sq = dist * dist                                       # torch.pow(sqrt(.), 2), bit-faithful
    hinge = jnp.maximum(margin - dist, 0.0)                     # clamp(margin - d, min=0)
    per_pair = 0.5 * lbl * dist_sq + 0.5 * (1.0 - lbl) * (hinge * hinge)

    # Mask rows past the true batch (ragged last block reads unspecified data).
    # Must stay a select — garbage rows may hold NaN/Inf, and NaN * 0 = NaN.
    row = jax.lax.broadcasted_iota(jnp.int32, per_pair.shape, 0) + i * tile_rows
    per_pair = jnp.where(row < batch, per_pair, 0.0)

    partial_ref[...] = jnp.sum(per_pair, keepdims=True)         # (1, 1) raw partial sum


def contrastive_loss(output1, output2, label, margin=MARGIN, *,
                     max_tile_rows=_MAX_TILE_ROWS):
    """output1, output2: (B, D) float (f32 or bf16); label: (B,). Returns scalar f32."""
    B, D = output1.shape
    itemsize = jnp.dtype(output1.dtype).itemsize
    sub = 16 if itemsize < 4 else 8       # packed (16,128) sublane tile for bf16/fp8

    # Feature dim: pad to a lane multiple only when it is "awkward" — not a
    # multiple of 128 but large enough that padding inflates HBM bytes by < 2x
    # (e.g. 96, 160, 200...).  Small D stays unpadded (block last dim == full
    # array dim is legal; padding would only inflate traffic for this
    # HBM-bound kernel).  Pad lanes are masked in-kernel before the eps add.
    dp128 = _round_up(D, _LANE)
    pad_d = (D % _LANE != 0) and (dp128 < 2 * D)
    Dp = dp128 if pad_d else D

    # Tile rows from a per-step VMEM budget counting *real* buffer sizes:
    # lane-padded inputs (2 arrays x 2 pipeline buffers) + the (TB, 1) f32
    # label blocks (lane-padded to 128, x 2 buffers).
    lane_padded_row = _round_up(Dp, _LANE) * itemsize
    bytes_per_row = 2 * 2 * lane_padded_row + 2 * _LANE * 4
    tb = _VMEM_TILE_BUDGET // max(1, bytes_per_row)
    tb = max(sub, (tb // sub) * sub)
    cap = max(sub, (max_tile_rows // sub) * sub)
    tb = min(tb, cap)
    tb = min(tb, _round_up(B, sub))       # never bigger than the (aligned) batch

    n_tiles = pl.cdiv(B, tb)              # ragged last block; no host batch padding

    if pad_d:
        output1 = jnp.pad(output1, ((0, 0), (0, Dp - D)))
        output2 = jnp.pad(output2, ((0, 0), (0, Dp - D)))
    lbl2d = label.reshape(B, 1).astype(jnp.float32)

    kernel = functools.partial(
        _contrastive_loss_kernel, batch=B, tile_rows=tb,
        margin=float(margin), feat_dim=D)

    partials = pl.pallas_call(
        kernel,
        out_shape=jax.ShapeDtypeStruct((n_tiles, 1), jnp.float32),
        grid_spec=pltpu.PrefetchScalarGridSpec(
            num_scalar_prefetch=0,
            grid=(n_tiles,),
            in_specs=[
                pl.BlockSpec((tb, Dp), lambda i: (i, 0)),
                pl.BlockSpec((tb, Dp), lambda i: (i, 0)),
                pl.BlockSpec((tb, 1), lambda i: (i, 0)),
            ],
            out_specs=pl.BlockSpec((1, 1), lambda i: (i, 0)),
        ),
        compiler_params=pltpu.CompilerParams(
            dimension_semantics=("parallel",),   # per-tile partials -> megacore on v7x
            vmem_limit_bytes=_VMEM_LIMIT,
        ),
    )(output1, output2, lbl2d)

    # Final reduce over n_tiles scalars + true-batch mean (torch.mean).
    return jnp.sum(partials) / jnp.float32(B)


def _reference_loss(output1, output2, label, margin=MARGIN):
    # Pure-JAX reference mirroring the PyTorch forward.
    diff = output1.astype(jnp.float32) - output2.astype(jnp.float32) + _PD_EPS
    d = jnp.sqrt(jnp.sum(diff * diff, axis=-1))
    hinge = jnp.maximum(margin - d, 0.0)
    return jnp.mean(0.5 * label * d ** 2 + 0.5 * (1.0 - label) * hinge ** 2)


if __name__ == "__main__":
    key = jax.random.PRNGKey(0)

    def check(B, D, dtype, tol, **kw):
        k1, k2, k3 = jax.random.split(jax.random.fold_in(key, B * 1000 + D), 3)
        o1 = jax.random.normal(k1, (B, D), dtype=jnp.float32).astype(dtype)
        o2 = jax.random.normal(k2, (B, D), dtype=jnp.float32).astype(dtype)
        lbl = jax.random.bernoulli(k3, p=0.5, shape=(B,)).astype(jnp.float32)
        got = jax.block_until_ready(contrastive_loss(o1, o2, lbl, **kw))
        ref = _reference_loss(o1, o2, lbl)
        assert jnp.allclose(got, ref, rtol=tol, atol=tol), (B, D, float(got), float(ref))

    # Siamese head output: small embedding pairs (primary case).
    check(16, 32, jnp.float32, 1e-5)
    # Ragged batch + multi-tile grid (exercises parallel per-tile partial sums).
    check(50, 32, jnp.float32, 1e-5, max_tile_rows=16)
    # bf16 inputs (half HBM traffic) + awkward D padded to a lane multiple.
    check(50, 160, jnp.bfloat16, 1e-4)

    print("KERNEL_OK")
</pallas_src>

<mosaic_0001>
module attributes {stable_mosaic.version = 11 : i64} {
  func.func @_contrastive_loss_kernel(%arg0: i32, %arg1: memref<16x32xf32, #tpu.memory_space<vmem>>, %arg2: memref<16x32xf32, #tpu.memory_space<vmem>>, %arg3: memref<16x1xf32, #tpu.memory_space<vmem>>, %arg4: memref<1x1xf32, #tpu.memory_space<vmem>>) attributes {dimension_semantics = [#tpu.dimension_semantics<parallel>], iteration_bounds = array<i64: 1>, scalar_prefetch = 0 : i64, scratch_operands = 0 : i64, tpu.core_type = #tpu.core_type<tc>, window_params = [{transform_indices = @transform_0, window_bounds = array<i64: 16, 32>}, {transform_indices = @transform_1, window_bounds = array<i64: 16, 32>}, {transform_indices = @transform_2, window_bounds = array<i64: 16, 1>}, {transform_indices = @transform_3, window_bounds = array<i64: 1, 1>}]} {
    %c0 = arith.constant 0 : index
    %c0_0 = arith.constant 0 : index
    %0 = vector.load %arg1[%c0, %c0_0] : memref<16x32xf32, #tpu.memory_space<vmem>>, vector<16x32xf32>
    %c0_1 = arith.constant 0 : index
    %c0_2 = arith.constant 0 : index
    %1 = vector.load %arg2[%c0_1, %c0_2] : memref<16x32xf32, #tpu.memory_space<vmem>>, vector<16x32xf32>
    %c0_3 = arith.constant 0 : index
    %c0_4 = arith.constant 0 : index
    %2 = vector.load %arg3[%c0_3, %c0_4] : memref<16x1xf32, #tpu.memory_space<vmem>>, vector<16x1xf32>
    %3 = arith.subf %0, %1 : vector<16x32xf32>
    %cst = arith.constant 9.99999997E-7 : f32
    %4 = vector.broadcast %cst : f32 to vector<16x32xf32>
    %5 = arith.addf %3, %4 : vector<16x32xf32>
    %6 = arith.mulf %5, %5 : vector<16x32xf32>
    %cst_5 = arith.constant dense<0.000000e+00> : vector<16xf32>
    %7 = vector.multi_reduction <add>, %6, %cst_5 [1] : vector<16x32xf32> to vector<16xf32>
    %8 = vector.shape_cast %7 : vector<16xf32> to vector<16x1xf32>
    %9 = math.sqrt %8 : vector<16x1xf32>
    %10 = arith.mulf %9, %9 : vector<16x1xf32>
    %cst_6 = arith.constant 2.000000e+00 : f32
    %11 = vector.broadcast %cst_6 : f32 to vector<16x1xf32>
    %12 = arith.subf %11, %9 : vector<16x1xf32>
    %cst_7 = arith.constant 0.000000e+00 : f32
    %13 = vector.broadcast %cst_7 : f32 to vector<16x1xf32>
    %14 = arith.maximumf %12, %13 : vector<16x1xf32>
    %cst_8 = arith.constant 5.000000e-01 : f32
    %15 = vector.broadcast %cst_8 : f32 to vector<16x1xf32>
    %16 = arith.mulf %15, %2 : vector<16x1xf32>
    %17 = arith.mulf %16, %10 : vector<16x1xf32>
    %cst_9 = arith.constant 1.000000e+00 : f32
    %18 = vector.broadcast %cst_9 : f32 to vector<16x1xf32>
    %19 = arith.subf %18, %2 : vector<16x1xf32>
    %cst_10 = arith.constant 5.000000e-01 : f32
    %20 = vector.broadcast %cst_10 : f32 to vector<16x1xf32>
    %21 = arith.mulf %20, %19 : vector<16x1xf32>
    %22 = arith.mulf %14, %14 : vector<16x1xf32>
    %23 = arith.mulf %21, %22 : vector<16x1xf32>
    %24 = arith.addf %17, %23 : vector<16x1xf32>
    %25 = tpu.iota {dimensions = array<i32: 0>} : vector<16x1xi32>
    %c16_i32 = arith.constant 16 : i32
    %26 = arith.muli %arg0, %c16_i32 : i32
    %27 = vector.broadcast %26 : i32 to vector<16x1xi32>
    %28 = arith.addi %25, %27 : vector<16x1xi32>
    %c16_i32_11 = arith.constant 16 : i32
    %29 = vector.broadcast %c16_i32_11 : i32 to vector<16x1xi32>
    %30 = arith.cmpi slt, %28, %29 : vector<16x1xi32>
    %cst_12 = arith.constant 0.000000e+00 : f32
    %31 = vector.broadcast %cst_12 : f32 to vector<16x1xf32>
    %32 = arith.select %30, %24, %31 : vector<16x1xi1>, vector<16x1xf32>
    %33 = vector.shape_cast %32 : vector<16x1xf32> to vector<1x16x1xf32>
    %cst_13 = arith.constant dense<0.000000e+00> : vector<1xf32>
    %34 = vector.multi_reduction <add>, %33, %cst_13 [1, 2] : vector<1x16x1xf32> to vector<1xf32>
    %35 = vector.shape_cast %34 : vector<1xf32> to vector<1x1x1xf32>
    %36 = vector.extract %35[0, 0, 0] : f32 from vector<1x1x1xf32>
    %37 = vector.broadcast %36 : f32 to vector<1x1xf32>
    %c0_14 = arith.constant 0 : index
    %c0_15 = arith.constant 0 : index
    %38 = vector.load %arg4[%c0_14, %c0_15] : memref<1x1xf32, #tpu.memory_space<vmem>>, vector<1x1xf32>
    tpu.vector_store %arg4[%c0_14, %c0_15], %37 {strides = array<i32>} : memref<1x1xf32, #tpu.memory_space<vmem>>, vector<1x1xf32>,
    return
  }
  func.func @transform_0(%arg0: i32) -> (i32, i32) {
    %c0_i32 = arith.constant 0 : i32
    %c0_i32_0 = arith.constant 0 : i32
    return %arg0, %c0_i32 : i32, i32
  }
  func.func @transform_1(%arg0: i32) -> (i32, i32) {
    %c0_i32 = arith.constant 0 : i32
    %c0_i32_0 = arith.constant 0 : i32
    return %arg0, %c0_i32 : i32, i32
  }
  func.func @transform_2(%arg0: i32) -> (i32, i32) {
    %c0_i32 = arith.constant 0 : i32
    %c0_i32_0 = arith.constant 0 : i32
    return %arg0, %c0_i32 : i32, i32
  }
  func.func @transform_3(%arg0: i32) -> (i32, i32) {
    %c0_i32 = arith.constant 0 : i32
    %c0_i32_0 = arith.constant 0 : i32
    return %arg0, %c0_i32 : i32, i32
  }
}

</mosaic_0001>

<bundles_post_ra>
// kernel: tpu_custom_call.1
= control target key start
LH: loop header
LB: loop body
LE: loop exit
PB: predicated region body
PF: predicated region fallthrough
CT: control target
= control target key end

     0   :  { %8 = vsyncpa [#allocation3], 0  ;;  %s220_s0 = inlined_call_operand.vmem [shape: f32[16,32], index: 0, kind: input, shape index: {}]   ;;  %s221_s1 = inlined_call_operand.hbm [shape: f32[16,32], index: 1, kind: input, shape index: {}]   ;;  %s222_s2 = inlined_call_operand.vmem [shape: f32[16,1], index: 2, kind: input, shape index: {}]   ;;  %s223_s3 = inlined_call_operand.hbm [shape: f32[1,1], index: 3, kind: output, shape index: {}]  }
   0x1   :  { %9 = vsyncpa [#allocation4], 0  ;;  %s178_s12 = smov [#allocation2]  }
   0x2   :  { %s17_s13 = sshll.u32 %s178_s12, 4  ;;  %s18_s13 = int_to_ptr.vmem [resolvable:$true] %s17_s13 }
   0x3   :  { %s142_s14 = scalar_lea.vmem %s18_s13, 256  ;;  %p147_p1 = scmp.lt.s32.totalorder %s18_s13, %s18_s13 }
   0x4   :  { %p143_p0 = scmp.ne.s32.totalorder %s18_s13, %s142_s14  ;;  %p148_p2 = scmp.lt.s32.totalorder %s142_s14, %s142_s14 }
   0x6   :  { %p149_p3 = por %p148_p2, %p147_p1 }
   0x8   :  { %p150_p4 = pnand %p149_p3, %p143_p0 }
   0xa   :  { %153 = shalt.err (!%p150_p4)
}
   0xb   :  { %s179_s15 = smov 128   ;;  %s180_s16 = smov 8  }
   0xc   :  { %23 = dma.hbm_to_vmem [thread:$0]  %s221_s1, 256, %s18_s13, [#allocation3], %s179_s15, %s179_s15, %s180_s16  }
   0xd   :  { %174 = dma.done.wait [#allocation3], 256  }
   0xe   :  { %175 = vsyncadd [#allocation3], 4294967040  ;;  %v29_v0 = vld [vmem:[%s220_s0] sm:$0xff]  ;;  %v30_v2 = vld [vmem:[%s220_s0 + $0x8] sm:$0xff]  ;;  %vm41_vm0 = vcmask 261120   ;;  %vm93_vm5 = vcmask 7168  }
   0xf   :  { %v31_v1 = vld [vmem:[#allocation2] sm:$0xff]  ;;  %v32_v4 = vld [vmem:[#allocation2 + $0x8] sm:$0xff]  ;;  %vm107_vm6 = vcmask 0  }
  0x10   :  { %v35_v3 = vsub.f32 %v29_v0, %v31_v1  ;;  %v36_v5 = vsub.f32 %v30_v2, %v32_v4  ;;  %v33_v16 = vld [vmem:[%s222_s2] sm:$0xff]  ;;  %v34_v25 = vld [vmem:[%s222_s2 + $0x8] sm:$0xff]  ;;  %s181_s2 = smov [#allocation5]  }
  0x11   :  { %v72_v18 = vsub.f32 1.0, %v33_v16  ;;  %v73_v29 = vsub.f32 1.0, %v34_v25  ;;  %v68_v33 = vmul.f32 0.5, %v33_v16  ;;  %v69_v35 = vmul.f32 0.5, %v34_v25  ;;  %s115_s25 = sshll.u32 %s181_s2, 4  ;;  %s116_s25 = int_to_ptr.vmem [resolvable:$true] %s115_s25 }
  0x12   :  { %v37_v6 = vadd.f32 1e-06, %v35_v3  ;;  %v38_v7 = vadd.f32 1e-06, %v36_v5  ;;  %s154_s27 = scalar_lea.vmem %s116_s25, 16  ;;  %s158_s28 = scalar_lea.vmem %s116_s25, 32 }
  0x13   :  { %v74_v26 = vmul.f32 0.5, %v72_v18  ;;  %v75_v38 = vmul.f32 0.5, %v73_v29  ;;  %p155_p5 = scmp.ne.s32.totalorder %s116_s25, %s154_s27  ;;  %p159_p6 = scmp.lt.s32.totalorder %s116_s25, %s116_s25 }
  0x14   :  { %v39_v8 = vmul.f32 %v37_v6, %v37_v6  ;;  %v40_v9 = vmul.f32 %v38_v7, %v38_v7  ;;  %p160_p7 = scmp.lt.s32.totalorder %s158_s28, %s154_s27 }
  0x16   :  { %v42_v10 = vsel %vm41_vm0, %v39_v8, 0.0  ;;  %v45_v11 = vsel %vm41_vm0, %v40_v9, 0.0  ;;  %p161_p8 = por %p160_p7, %p159_p6 }
  0x17   :  { %43 = vadd.xlane.f32.xlu0 %v42_v10 }
  0x18   :  { %p162_p9 = pnand %p161_p8, %p155_p5 }
  0x1b   :  { %46 = vadd.xlane.f32.xlu0 %v45_v11 }
  0xa0   :  { %v44_v12 = vpop.xlane.xlu0 %43 }
  0xa1   :  { %130 = vrsqrt.f32 %v44_v12  ;;  %vm50_vm1 = vcmp.eq.f32.partialorder %v44_v12, inf  ;;  %v53_v17 = vand.u32 2147483648, %v44_v12  ;;  %vm52_vm2 = vcmp.eq.f32.partialorder %v44_v12, 0.0 }
  0xa4   :  { %v47_v13 = vpop.xlane.xlu0 %46 }
  0xa5   :  { %132 = vrsqrt.f32 %v47_v13  ;;  %vm57_vm3 = vcmp.eq.f32.partialorder %v47_v13, inf  ;;  %v60_v24 = vand.u32 2147483648, %v47_v13  ;;  %vm59_vm4 = vcmp.eq.f32.partialorder %v47_v13, 0.0 }
  0xae   :  { %v131_v14 = vpop.eup %130 }
  0xaf   :  { %v49_v15 = vmul.f32 %v131_v14, %v44_v12 }
  0xb1   :  { %v51_v19 = vsel %vm50_vm1, %v44_v12, %v49_v15 }
  0xb2   :  { %v133_v20 = vpop.eup %132  ;;  %v54_v21 = vsel %vm52_vm2, %v53_v17, %v51_v19 }
  0xb3   :  { %v56_v22 = vmul.f32 %v133_v20, %v47_v13  ;;  %v64_v23 = vsub.f32 2.0, %v54_v21  ;;  %v62_v31 = vmul.f32 %v54_v21, %v54_v21 }
  0xb5   :  { %v58_v27 = vsel %vm57_vm3, %v47_v13, %v56_v22  ;;  %v66_v28 = vmax.f32 %v64_v23, 0.0  ;;  %v70_v40 = vmul.f32 %v68_v33, %v62_v31 }
  0xb6   :  { %v61_v30 = vsel %vm59_vm4, %v60_v24, %v58_v27 }
  0xb7   :  { %v65_v32 = vsub.f32 2.0, %v61_v30  ;;  %v76_v34 = vmul.f32 %v66_v28, %v66_v28  ;;  %v63_v36 = vmul.f32 %v61_v30, %v61_v30 }
  0xb9   :  { %v67_v37 = vmax.f32 %v65_v32, 0.0  ;;  %v78_v39 = vmul.f32 %v76_v34, %v74_v26  ;;  %v71_v42 = vmul.f32 %v69_v35, %v63_v36 }
  0xbb   :  { %v77_v41 = vmul.f32 %v67_v37, %v67_v37  ;;  %v80_v44 = vadd.f32 %v78_v39, %v70_v40 }
  0xbd   :  { %v79_v43 = vmul.f32 %v77_v41, %v75_v38  ;;  %v94_v46 = vsel %vm93_vm5, %v80_v44, 0.0 }
  0xbf   :  { %v81_v45 = vadd.f32 %v79_v43, %v71_v42 }
  0xc1   :  { %v95_v47 = vsel %vm93_vm5, %v81_v45, 0.0 }
  0xc2   :  { %v96_v48 = vadd.f32 %v95_v47, %v94_v46 }
  0xc4   :  { %97 = vadd.xlane.f32.xlu1 %v96_v48 }
 0x14d   :  { %v98_v49 = vpop.xlane.xlu1 %97 }
 0x14e   :  { %v99_v50 = vrot.slane %v98_v49, 4 }
 0x150   :  { %v100_v51 = vadd.f32 %v99_v50, %v98_v49 }
 0x152   :  { %v101_v52 = vrot.slane %v100_v51, 2 }
 0x154   :  { %v102_v53 = vadd.f32 %v101_v52, %v100_v51 }
 0x156   :  { %v103_v54 = vrot.slane %v102_v53, 1 }
 0x158   :  { %v104_v55 = vadd.f32 %v103_v54, %v102_v53 }
 0x15a   :  { %124 = vpush %v104_v55 }
 0x18b   :  { %s125_s26 = spop %124 }
 0x18c   :  { %v106_v56 = vstv %s125_s26 }
 0x18d   :  { %108 = vst.msk [vmem:[#allocation5] sm:$0x1] %vm107_vm6, %v106_v56 }
 0x18e   :  { %165 = shalt.err (!%p162_p9)
}
 0x18f   :  { %118 = dma.vmem_to_hbm [thread:$0]  %s116_s25, 16, %s223_s3, [#allocation4]  }
 0x190   :  { %176 = dma.done.wait [#allocation4], 16  }
 0x191   :  { %177 = vsyncadd [#allocation4], 4294967280 }
 0x192   :  { %122 = vsyncpa [#allocation3], 1 }
 0x193   :  { %123 = vsyncpa [#allocation4], 1 }

</bundles_post_ra>
